<compile_context>
chip_gen: v5e
topology: v5e:2x2
jax: 0.10.0
libtpu: 0.0.40
codegen_flags: <defaults>
</compile_context>

<pallas_src>
import functools

import jax
import jax.numpy as jnp
from jax.experimental import pallas as pl
from jax.experimental.pallas import tpu as pltpu


def _round_up(x, m):
    return (x + m - 1) // m * m


def _feature_pad(d):
    # v6e/v7x MXUs are 2x256x256: round hidden/output dims >128 up to 256-lane multiples;
    # keep a single 128-lane tile for small dims (v5e's 128-wide MXU is already matched).
    return 128 if d <= 128 else _round_up(d, 256)


def _vmem_usable_bytes():
    """Generation-aware VMEM ceiling (~80% of physical capacity)."""
    try:
        cap = int(getattr(pltpu.get_tpu_info(), "vmem_capacity_bytes"))
    except Exception:
        cap = 64 * 1024 * 1024  # conservative (v7x per-TC) fallback
    return int(cap * 0.8)


def residual_net_kernel(x_ref, w_init_ref, w_blk_ref, w_fin_ref,
                        b_hid_ref, b_fin_ref, o_ref):
    """Whole ResidualNet forward for one batch tile, fully resident in VMEM.

    x_ref:      (tile_b, in_p)   bf16
    w_init_ref: (in_p, Hp)       bf16
    w_blk_ref:  (4, Hp, Hp)      bf16   rows = [blk0.lin0, blk0.lin1, blk1.lin0, blk1.lin1]
    w_fin_ref:  (Hp, Op)         bf16
    b_hid_ref:  (5, Hp)          f32    rows = [b_init, b10, b11, b20, b21]
    b_fin_ref:  (1, Op)          f32
    o_ref:      (tile_b, Op)     f32 or bf16
    """
    x = x_ref[...]

    # Hoist bias rows once per invocation (JAX does not CSE broadcast_in_dim).
    b_init = b_hid_ref[0:1, :]
    b10 = b_hid_ref[1:2, :]
    b11 = b_hid_ref[2:3, :]
    b20 = b_hid_ref[3:4, :]
    b21 = b_hid_ref[4:5, :]

    # initial_layer: bf16 MXU operands, f32 accumulation.
    h = jnp.dot(x, w_init_ref[...], preferred_element_type=jnp.float32) + b_init

    # Two residual blocks: relu -> linear -> relu -> linear -> add (statically unrolled).
    for wa_i, ba, wb_i, bb in ((0, b10, 1, b11), (2, b20, 3, b21)):
        t = jnp.maximum(h, 0.0)
        t = jnp.dot(t.astype(jnp.bfloat16), w_blk_ref[wa_i],
                    preferred_element_type=jnp.float32) + ba
        t = jnp.maximum(t, 0.0)
        t = jnp.dot(t.astype(jnp.bfloat16), w_blk_ref[wb_i],
                    preferred_element_type=jnp.float32) + bb
        h = h + t

    # final_layer
    out = jnp.dot(h.astype(jnp.bfloat16), w_fin_ref[...],
                  preferred_element_type=jnp.float32) + b_fin_ref[...]
    o_ref[...] = out.astype(o_ref.dtype)


def prepare_params(params):
    """One-time packing of the (pre-transposed) params into padded, MXU-friendly arrays.

    Call once; reuse the returned (prepped, dims) across forward calls so no padding /
    stacking / casting runs on the per-call path.
    """
    in_dim, hidden = params["w_init"].shape
    out_dim = params["w_fin"].shape[1]

    in_p = _round_up(in_dim, 16)       # bf16 sublane quantum only; no 128-lane blow-up for x
    Hp = _feature_pad(hidden)
    Op = _feature_pad(out_dim)

    def pad2(a, r, c):
        return jnp.pad(a, ((0, r - a.shape[0]), (0, c - a.shape[1])))

    def pad_bias(b, n):
        b = b.reshape(-1)
        return jnp.pad(b, (0, n - b.shape[0]))

    prepped = {
        "w_init": pad2(params["w_init"], in_p, Hp).astype(jnp.bfloat16),
        "w_blk": jnp.stack([
            pad2(params["w10"], Hp, Hp),
            pad2(params["w11"], Hp, Hp),
            pad2(params["w20"], Hp, Hp),
            pad2(params["w21"], Hp, Hp),
        ]).astype(jnp.bfloat16),
        "w_fin": pad2(params["w_fin"], Hp, Op).astype(jnp.bfloat16),
        "b_hid": jnp.stack([
            pad_bias(params["b_init"], Hp),
            pad_bias(params["b10"], Hp),
            pad_bias(params["b11"], Hp),
            pad_bias(params["b20"], Hp),
            pad_bias(params["b21"], Hp),
        ]).astype(jnp.float32),
        "b_fin": pad2(params["b_fin"].reshape(1, -1), 1, Op).astype(jnp.float32),
    }
    dims = (int(in_dim), int(hidden), int(out_dim))
    return prepped, dims


@functools.partial(jax.jit, static_argnames=("dims", "tile_b_max", "out_bf16"))
def residual_net_forward(x, prepped, *, dims, tile_b_max=512, out_bf16=False):
    """x: (B, in_dim) float32. prepped/dims: output of prepare_params()."""
    in_dim, hidden, out_dim = dims
    B = x.shape[0]

    w_init, w_blk, w_fin = prepped["w_init"], prepped["w_blk"], prepped["w_fin"]
    b_hid, b_fin = prepped["b_hid"], prepped["b_fin"]
    in_p, Hp = w_init.shape
    Op = w_fin.shape[1]

    # Balanced batch tiling; >=2 grid steps once B >= 32 so v7x can shard across both TCs.
    n_tiles = pl.cdiv(B, tile_b_max)
    if B >= 32:
        n_tiles = max(n_tiles, 2)
    tile_b = _round_up(pl.cdiv(B, n_tiles), 16)
    B_pad = n_tiles * tile_b

    x_p = jnp.pad(x, ((0, B_pad - B), (0, in_p - in_dim))).astype(jnp.bfloat16)

    out_dtype = jnp.bfloat16 if out_bf16 else jnp.float32
    out_bytes = 2 if out_bf16 else 4

    # VMEM budget: double-buffered activation tiles + single-buffered weights + f32 working set.
    weight_bytes = (in_p * Hp + 4 * Hp * Hp + Hp * Op) * 2 + (5 * Hp + Op) * 4
    act_bytes = 2 * tile_b * in_p * 2 + 2 * tile_b * Op * out_bytes
    work_bytes = 6 * tile_b * Hp * 4
    est = weight_bytes + act_bytes + work_bytes
    vmem_limit = int(min(_vmem_usable_bytes(), max(int(1.5 * est), 4 * 1024 * 1024)))

    def x_map(i):
        return (i, 0)

    def const2(i):
        return (0, 0)

    def const3(i):
        return (0, 0, 0)

    single = pl.Buffered(1)  # grid-invariant operands: no prefetch overlap needed

    out_p = pl.pallas_call(
        residual_net_kernel,
        out_shape=jax.ShapeDtypeStruct((B_pad, Op), out_dtype),
        grid=(B_pad // tile_b,),
        in_specs=[
            pl.BlockSpec((tile_b, in_p), x_map),
            pl.BlockSpec((in_p, Hp), const2, pipeline_mode=single),
            pl.BlockSpec((4, Hp, Hp), const3, pipeline_mode=single),
            pl.BlockSpec((Hp, Op), const2, pipeline_mode=single),
            pl.BlockSpec((5, Hp), const2, pipeline_mode=single),
            pl.BlockSpec((1, Op), const2, pipeline_mode=single),
        ],
        out_specs=pl.BlockSpec((tile_b, Op), x_map),
        compiler_params=pltpu.CompilerParams(
            dimension_semantics=("parallel",),
            vmem_limit_bytes=vmem_limit),
    )(x_p, w_init, w_blk, w_fin, b_hid, b_fin)

    return out_p[:B, :out_dim]


def init_params(key, in_dim, hidden_dim, out_dim):
    """Deterministic init mimicking PyTorch defaults; weights stored transposed (in, out)."""
    ks = jax.random.split(key, 16)

    def linear(kw, kb, fan_in, fan_out, zero_init=False):
        if zero_init:
            bound = 0.001  # nn.init.uniform_(-0.001, 0.001) on the block's last layer
        else:
            bound = 1.0 / jnp.sqrt(fan_in)
        w = jax.random.uniform(kw, (fan_in, fan_out), jnp.float32, -bound, bound)
        b = jax.random.uniform(kb, (1, fan_out), jnp.float32, -bound, bound)
        return w, b

    p = {}
    p["w_init"], p["b_init"] = linear(ks[0], ks[1], in_dim, hidden_dim)
    p["w10"], p["b10"] = linear(ks[2], ks[3], hidden_dim, hidden_dim)
    p["w11"], p["b11"] = linear(ks[4], ks[5], hidden_dim, hidden_dim, zero_init=True)
    p["w20"], p["b20"] = linear(ks[6], ks[7], hidden_dim, hidden_dim)
    p["w21"], p["b21"] = linear(ks[8], ks[9], hidden_dim, hidden_dim, zero_init=True)
    p["w_fin"], p["b_fin"] = linear(ks[10], ks[11], hidden_dim, out_dim)
    return p


def residual_net_reference(x, p):
    """Pure-JAX f32 reference (matches the PyTorch module)."""
    h = x @ p["w_init"] + p["b_init"]
    for wa, ba, wb, bb in (("w10", "b10", "w11", "b11"),
                           ("w20", "b20", "w21", "b21")):
        t = jnp.maximum(h, 0.0)
        t = t @ p[wa] + p[ba]
        t = jnp.maximum(t, 0.0)
        t = t @ p[wb] + p[bb]
        h = h + t
    return h @ p["w_fin"] + p["b_fin"]


if __name__ == "__main__":
    key = jax.random.PRNGKey(0)
    k_x, k_p = jax.random.split(key)

    batch, in_dim, hidden_dim, out_dim = 16, 32, 64, 32
    x = jax.random.normal(k_x, (batch, in_dim), jnp.float32)
    params = init_params(k_p, in_dim, hidden_dim, out_dim)

    prepped, dims = prepare_params(params)          # one-time packing (not on the call path)
    out = residual_net_forward(x, prepped, dims=dims)
    out = jax.block_until_ready(out)

    ref = residual_net_reference(x, params)
    assert out.shape == (batch, out_dim)
    # bf16 MXU operands with f32 accumulation -> loosened tolerance vs. the pure-f32 reference.
    assert jnp.allclose(out, ref, atol=2e-2, rtol=2e-2), float(jnp.max(jnp.abs(out - ref)))

    print("KERNEL_OK")
</pallas_src>

<mosaic_0001>
module attributes {stable_mosaic.version = 11 : i64} {
  func.func @residual_net_kernel(%arg0: i32, %arg1: memref<16x32xbf16, #tpu.memory_space<vmem>>, %arg2: memref<32x128xbf16, #tpu.memory_space<vmem>>, %arg3: memref<4x128x128xbf16, #tpu.memory_space<vmem>>, %arg4: memref<128x128xbf16, #tpu.memory_space<vmem>>, %arg5: memref<5x128xf32, #tpu.memory_space<vmem>>, %arg6: memref<1x128xf32, #tpu.memory_space<vmem>>, %arg7: memref<16x128xf32, #tpu.memory_space<vmem>>) attributes {dimension_semantics = [#tpu.dimension_semantics<parallel>], iteration_bounds = array<i64: 1>, scalar_prefetch = 0 : i64, scratch_operands = 0 : i64, tpu.core_type = #tpu.core_type<tc>, window_params = [{transform_indices = @transform_0, window_bounds = array<i64: 16, 32>}, {pipeline_mode = #tpu.pipeline_mode<synchronous>, transform_indices = @transform_1, window_bounds = array<i64: 32, 128>}, {pipeline_mode = #tpu.pipeline_mode<synchronous>, transform_indices = @transform_2, window_bounds = array<i64: 4, 128, 128>}, {pipeline_mode = #tpu.pipeline_mode<synchronous>, transform_indices = @transform_3, window_bounds = array<i64: 128, 128>}, {pipeline_mode = #tpu.pipeline_mode<synchronous>, transform_indices = @transform_4, window_bounds = array<i64: 5, 128>}, {pipeline_mode = #tpu.pipeline_mode<synchronous>, transform_indices = @transform_5, window_bounds = array<i64: 1, 128>}, {transform_indices = @transform_6, window_bounds = array<i64: 16, 128>}]} {
    %c0 = arith.constant 0 : index
    %c0_0 = arith.constant 0 : index
    %0 = vector.load %arg1[%c0, %c0_0] : memref<16x32xbf16, #tpu.memory_space<vmem>>, vector<16x32xbf16>
    %c0_1 = arith.constant 0 : index
    %c0_2 = arith.constant 0 : index
    %1 = vector.load %arg5[%c0_1, %c0_2] : memref<5x128xf32, #tpu.memory_space<vmem>>, vector<1x128xf32>
    %c1 = arith.constant 1 : index
    %c0_3 = arith.constant 0 : index
    %2 = vector.load %arg5[%c1, %c0_3] : memref<5x128xf32, #tpu.memory_space<vmem>>, vector<1x128xf32>
    %c2 = arith.constant 2 : index
    %c0_4 = arith.constant 0 : index
    %3 = vector.load %arg5[%c2, %c0_4] : memref<5x128xf32, #tpu.memory_space<vmem>>, vector<1x128xf32>
    %c3 = arith.constant 3 : index
    %c0_5 = arith.constant 0 : index
    %4 = vector.load %arg5[%c3, %c0_5] : memref<5x128xf32, #tpu.memory_space<vmem>>, vector<1x128xf32>
    %c4 = arith.constant 4 : index
    %c0_6 = arith.constant 0 : index
    %5 = vector.load %arg5[%c4, %c0_6] : memref<5x128xf32, #tpu.memory_space<vmem>>, vector<1x128xf32>
    %c0_7 = arith.constant 0 : index
    %c0_8 = arith.constant 0 : index
    %6 = vector.load %arg2[%c0_7, %c0_8] : memref<32x128xbf16, #tpu.memory_space<vmem>>, vector<32x128xbf16>
    %cst = arith.constant dense<0.000000e+00> : vector<16x128xf32>
    %7 = tpu.matmul %0, %6, %cst {dimension_numbers = #tpu.dot_dimension_numbers<[1], [0], [0], [1], [0, 0, 1, 1], [], []>} : vector<16x32xbf16>, vector<32x128xbf16>, vector<16x128xf32> -> vector<16x128xf32>
    %8 = vector.broadcast %1 : vector<1x128xf32> to vector<16x128xf32>
    %9 = arith.addf %7, %8 : vector<16x128xf32>
    %cst_9 = arith.constant 0.000000e+00 : f32
    %10 = vector.broadcast %cst_9 : f32 to vector<16x128xf32>
    %11 = arith.maximumf %9, %10 : vector<16x128xf32>
    %12 = arith.truncf %11 : vector<16x128xf32> to vector<16x128xbf16>
    %c0_10 = arith.constant 0 : index
    %c0_11 = arith.constant 0 : index
    %c0_12 = arith.constant 0 : index
    %13 = vector.load %arg3[%c0_10, %c0_11, %c0_12] : memref<4x128x128xbf16, #tpu.memory_space<vmem>>, vector<1x128x128xbf16>
    %14 = vector.shape_cast %13 : vector<1x128x128xbf16> to vector<128x128xbf16>
    %cst_13 = arith.constant dense<0.000000e+00> : vector<16x128xf32>
    %15 = tpu.matmul %12, %14, %cst_13 {dimension_numbers = #tpu.dot_dimension_numbers<[1], [0], [0], [1], [0, 0, 1, 1], [], []>} : vector<16x128xbf16>, vector<128x128xbf16>, vector<16x128xf32> -> vector<16x128xf32>
    %16 = vector.broadcast %2 : vector<1x128xf32> to vector<16x128xf32>
    %17 = arith.addf %15, %16 : vector<16x128xf32>
    %cst_14 = arith.constant 0.000000e+00 : f32
    %18 = vector.broadcast %cst_14 : f32 to vector<16x128xf32>
    %19 = arith.maximumf %17, %18 : vector<16x128xf32>
    %20 = arith.truncf %19 : vector<16x128xf32> to vector<16x128xbf16>
    %c1_15 = arith.constant 1 : index
    %c0_16 = arith.constant 0 : index
    %c0_17 = arith.constant 0 : index
    %21 = vector.load %arg3[%c1_15, %c0_16, %c0_17] : memref<4x128x128xbf16, #tpu.memory_space<vmem>>, vector<1x128x128xbf16>
    %22 = vector.shape_cast %21 : vector<1x128x128xbf16> to vector<128x128xbf16>
    %cst_18 = arith.constant dense<0.000000e+00> : vector<16x128xf32>
    %23 = tpu.matmul %20, %22, %cst_18 {dimension_numbers = #tpu.dot_dimension_numbers<[1], [0], [0], [1], [0, 0, 1, 1], [], []>} : vector<16x128xbf16>, vector<128x128xbf16>, vector<16x128xf32> -> vector<16x128xf32>
    %24 = vector.broadcast %3 : vector<1x128xf32> to vector<16x128xf32>
    %25 = arith.addf %23, %24 : vector<16x128xf32>
    %26 = arith.addf %9, %25 : vector<16x128xf32>
    %cst_19 = arith.constant 0.000000e+00 : f32
    %27 = vector.broadcast %cst_19 : f32 to vector<16x128xf32>
    %28 = arith.maximumf %26, %27 : vector<16x128xf32>
    %29 = arith.truncf %28 : vector<16x128xf32> to vector<16x128xbf16>
    %c2_20 = arith.constant 2 : index
    %c0_21 = arith.constant 0 : index
    %c0_22 = arith.constant 0 : index
    %30 = vector.load %arg3[%c2_20, %c0_21, %c0_22] : memref<4x128x128xbf16, #tpu.memory_space<vmem>>, vector<1x128x128xbf16>
    %31 = vector.shape_cast %30 : vector<1x128x128xbf16> to vector<128x128xbf16>
    %cst_23 = arith.constant dense<0.000000e+00> : vector<16x128xf32>
    %32 = tpu.matmul %29, %31, %cst_23 {dimension_numbers = #tpu.dot_dimension_numbers<[1], [0], [0], [1], [0, 0, 1, 1], [], []>} : vector<16x128xbf16>, vector<128x128xbf16>, vector<16x128xf32> -> vector<16x128xf32>
    %33 = vector.broadcast %4 : vector<1x128xf32> to vector<16x128xf32>
    %34 = arith.addf %32, %33 : vector<16x128xf32>
    %cst_24 = arith.constant 0.000000e+00 : f32
    %35 = vector.broadcast %cst_24 : f32 to vector<16x128xf32>
    %36 = arith.maximumf %34, %35 : vector<16x128xf32>
    %37 = arith.truncf %36 : vector<16x128xf32> to vector<16x128xbf16>
    %c3_25 = arith.constant 3 : index
    %c0_26 = arith.constant 0 : index
    %c0_27 = arith.constant 0 : index
    %38 = vector.load %arg3[%c3_25, %c0_26, %c0_27] : memref<4x128x128xbf16, #tpu.memory_space<vmem>>, vector<1x128x128xbf16>
    %39 = vector.shape_cast %38 : vector<1x128x128xbf16> to vector<128x128xbf16>
    %cst_28 = arith.constant dense<0.000000e+00> : vector<16x128xf32>
    %40 = tpu.matmul %37, %39, %cst_28 {dimension_numbers = #tpu.dot_dimension_numbers<[1], [0], [0], [1], [0, 0, 1, 1], [], []>} : vector<16x128xbf16>, vector<128x128xbf16>, vector<16x128xf32> -> vector<16x128xf32>
    %41 = vector.broadcast %5 : vector<1x128xf32> to vector<16x128xf32>
    %42 = arith.addf %40, %41 : vector<16x128xf32>
    %43 = arith.addf %26, %42 : vector<16x128xf32>
    %44 = arith.truncf %43 : vector<16x128xf32> to vector<16x128xbf16>
    %c0_29 = arith.constant 0 : index
    %c0_30 = arith.constant 0 : index
    %45 = vector.load %arg4[%c0_29, %c0_30] : memref<128x128xbf16, #tpu.memory_space<vmem>>, vector<128x128xbf16>
    %cst_31 = arith.constant dense<0.000000e+00> : vector<16x128xf32>
    %46 = tpu.matmul %44, %45, %cst_31 {dimension_numbers = #tpu.dot_dimension_numbers<[1], [0], [0], [1], [0, 0, 1, 1], [], []>} : vector<16x128xbf16>, vector<128x128xbf16>, vector<16x128xf32> -> vector<16x128xf32>
    %c0_32 = arith.constant 0 : index
    %c0_33 = arith.constant 0 : index
    %47 = vector.load %arg6[%c0_32, %c0_33] : memref<1x128xf32, #tpu.memory_space<vmem>>, vector<1x128xf32>
    %48 = vector.broadcast %47 : vector<1x128xf32> to vector<16x128xf32>
    %49 = arith.addf %46, %48 : vector<16x128xf32>
    %c0_34 = arith.constant 0 : index
    %c0_35 = arith.constant 0 : index
    %50 = vector.load %arg7[%c0_34, %c0_35] : memref<16x128xf32, #tpu.memory_space<vmem>>, vector<16x128xf32>
    tpu.vector_store %arg7[%c0_34, %c0_35], %49 {strides = array<i32>} : memref<16x128xf32, #tpu.memory_space<vmem>>, vector<16x128xf32>,
    return
  }
  func.func @transform_0(%arg0: i32) -> (i32, i32) {
    %c0_i32 = arith.constant 0 : i32
    %c0_i32_0 = arith.constant 0 : i32
    return %arg0, %c0_i32 : i32, i32
  }
  func.func @transform_1(%arg0: i32) -> (i32, i32) {
    %c0_i32 = arith.constant 0 : i32
    %c0_i32_0 = arith.constant 0 : i32
    %c0_i32_1 = arith.constant 0 : i32
    return %c0_i32, %c0_i32_0 : i32, i32
  }
  func.func @transform_2(%arg0: i32) -> (i32, i32, i32) {
    %c0_i32 = arith.constant 0 : i32
    %c0_i32_0 = arith.constant 0 : i32
    %c0_i32_1 = arith.constant 0 : i32
    %c0_i32_2 = arith.constant 0 : i32
    return %c0_i32, %c0_i32_0, %c0_i32_1 : i32, i32, i32
  }
  func.func @transform_3(%arg0: i32) -> (i32, i32) {
    %c0_i32 = arith.constant 0 : i32
    %c0_i32_0 = arith.constant 0 : i32
    %c0_i32_1 = arith.constant 0 : i32
    return %c0_i32, %c0_i32_0 : i32, i32
  }
  func.func @transform_4(%arg0: i32) -> (i32, i32) {
    %c0_i32 = arith.constant 0 : i32
    %c0_i32_0 = arith.constant 0 : i32
    %c0_i32_1 = arith.constant 0 : i32
    return %c0_i32, %c0_i32_0 : i32, i32
  }
  func.func @transform_5(%arg0: i32) -> (i32, i32) {
    %c0_i32 = arith.constant 0 : i32
    %c0_i32_0 = arith.constant 0 : i32
    %c0_i32_1 = arith.constant 0 : i32
    return %c0_i32, %c0_i32_0 : i32, i32
  }
  func.func @transform_6(%arg0: i32) -> (i32, i32) {
    %c0_i32 = arith.constant 0 : i32
    %c0_i32_0 = arith.constant 0 : i32
    return %arg0, %c0_i32 : i32, i32
  }
}

</mosaic_0001>

<bundles_post_ra>
// kernel: residual_net_forward.1
= control target key start
LH: loop header
LB: loop body
LE: loop exit
PB: predicated region body
PF: predicated region fallthrough
CT: control target
= control target key end

     0   :  { %11 = vsyncpa [#allocation3], 0  ;;  %s929_s0 = inlined_call_operand.vmem [shape: bf16[16,32], index: 0, kind: input, shape index: {}]   ;;  %s930_s1 = inlined_call_operand.vmem [shape: bf16[32,128], index: 1, kind: input, shape index: {}]   ;;  %s931_s2 = inlined_call_operand.hbm [shape: bf16[4,128,128], index: 2, kind: input, shape index: {}]   ;;  %s932_s3 = inlined_call_operand.hbm [shape: bf16[128,128], index: 3, kind: input, shape index: {}]   ;;  %s933_s4 = inlined_call_operand.vmem [shape: f32[5,128], index: 4, kind: input, shape index: {}]   ;;  %s934_s5 = inlined_call_operand.vmem [shape: f32[1,128], index: 5, kind: input, shape index: {}]   ;;  %s935_s6 = inlined_call_operand.hbm [shape: f32[16,128], index: 6, kind: output, shape index: {}]  }
   0x1   :  { %12 = vsyncpa [#allocation6], 0 }
   0x2   :  { %13 = vsyncpa [#allocation4], 0  ;;  %s22_s23 = sshll.u32 %s931_s2, 4  ;;  %s851_s24 = smov [#allocation2]   ;;  %s23_s23 = int_to_ptr.hbm [resolvable:$true] %s22_s23 }
   0x3   :  { %s24_s25 = sshll.u32 %s851_s24, 4  ;;  %s35_s28 = sshll.u32 %s932_s3, 4  ;;  %s25_s25 = int_to_ptr.vmem [resolvable:$true] %s24_s25  ;;  %s36_s28 = int_to_ptr.hbm [resolvable:$true] %s35_s28 }
   0x4   :  { %s852_s29 = smov 64   ;;  %s853_s30 = smov 4  }
   0x5   :  { %30 = dma.hbm_to_vmem [thread:$0]  %s23_s23, 4096, %s25_s25, [#allocation3], %s852_s29, %s852_s29, %s853_s30  }
   0x6   :  { %s854_s7 = smov [#allocation5]  }
   0x7   :  { %s37_s8 = sshll.u32 %s854_s7, 4  ;;  %s38_s8 = int_to_ptr.vmem [resolvable:$true] %s37_s8 }
   0x8   :  { %43 = dma.hbm_to_vmem [thread:$0]  %s36_s28, 1024, %s38_s8, [#allocation6], %s852_s29, %s852_s29, %s853_s30  }
   0x9   :  { %845 = dma.done.wait [#allocation3], 4096  }
   0xa   :  { %846 = vsyncadd [#allocation3], 4294963200 }
   0xb   :  { %847 = dma.done.wait [#allocation6], 1024  }
   0xc   :  { %848 = vsyncadd [#allocation6], 4294966272  ;;  %v719_v0 = vld [vmem:[%s930_s1 + $0x8] sm:$0xff]  ;;  %v727_v1 = vld [vmem:[#allocation2 + $0x38] sm:$0xff]  ;;  %vm86_vm0 = vcmask 261120   ;;  %s855_s23 = smov [#allocation7]  }
   0xd   :  { %96 = vmatpush.bf16.msra.mxu0 %v719_v0  ;;  %v718_v2 = vld [vmem:[%s930_s1] sm:$0xff]  ;;  %v726_v3 = vld [vmem:[#allocation2 + $0x30] sm:$0xff]  ;;  %172 = vmatpush.bf16.msra.mxu1 %v727_v1  ;;  %v725_v5 = vld [vmem:[#allocation2 + $0x28] sm:$0xff]  ;;  %s528_s24 = sshll.u32 %s855_s23, 4  ;;  %s856_s27 = smov 128   ;;  %s529_s24 = int_to_ptr.vmem [resolvable:$true] %s528_s24 }
   0xe   :  { %v717_v4 = vld [vmem:[%s929_s0] sm:$0xff]  ;;  %v723_v7 = vld [vmem:[#allocation2 + $0x18] sm:$0xff]  ;;  %v722_v8 = vld [vmem:[#allocation2 + $0x10] sm:$0xff]  ;;  %s857_s28 = smov 8  }
   0xf   :  { %v724_v6 = vld [vmem:[#allocation2 + $0x20] sm:$0xff]  ;;  %v721_v9 = vld [vmem:[#allocation2 + $0x8] sm:$0xff]  ;;  %v735_v11 = vld [vmem:[#allocation2 + $0x78] sm:$0xff] }
  0x10   :  { %v720_v10 = vld [vmem:[#allocation2] sm:$0xff]  ;;  %255 = vmatpush.bf16.msra.mxu2 %v735_v11  ;;  %v734_v12 = vld [vmem:[#allocation2 + $0x70] sm:$0xff]  ;;  %v733_v13 = vld [vmem:[#allocation2 + $0x68] sm:$0xff] }
  0x11   :  { %97 = vmatpush.bf16.msra.mxu0 %v718_v2  ;;  %173 = vmatpush.bf16.msra.mxu1 %v726_v3  ;;  %v732_v14 = vld [vmem:[#allocation2 + $0x60] sm:$0xff]  ;;  %v731_v23 = vld [vmem:[#allocation2 + $0x58] sm:$0xff]  ;;  %v730_v24 = vld [vmem:[#allocation2 + $0x50] sm:$0xff] }
  0x12   :  { %v767_v16 = vld [vmem:[%s933_s4] ss:$0 sm:$0xff]  ;;  %v729_v25 = vld [vmem:[#allocation2 + $0x48] sm:$0xff]  ;;  %v743_v27 = vld [vmem:[#allocation2 + $0xb8] sm:$0xff] }
  0x13   :  { %v728_v26 = vld [vmem:[#allocation2 + $0x40] sm:$0xff]  ;;  %340 = vmatpush.bf16.msra.mxu3 %v743_v27  ;;  %v742_v28 = vld [vmem:[#allocation2 + $0xb0] sm:$0xff]  ;;  %v741_v29 = vld [vmem:[#allocation2 + $0xa8] sm:$0xff] }
  0x14   :  { %556 = vmatmul.msk.bf16.vlgmr.msra.gmra.mxu0 %vm86_vm0, %v717_v4  ;;  %256 = vmatpush.bf16.msra.mxu2 %v734_v12  ;;  %v740_v30 = vld [vmem:[#allocation2 + $0xa0] sm:$0xff]  ;;  %v739_v39 = vld [vmem:[#allocation2 + $0x98] sm:$0xff]  ;;  %v738_v40 = vld [vmem:[#allocation2 + $0x90] sm:$0xff] }
  0x15   :  { %174 = vmatpush.bf16.msra.mxu1 %v725_v5  ;;  %v768_v32 = vld [vmem:[%s933_s4 + $0x1] ss:$0 sm:$0xff]  ;;  %v737_v41 = vld [vmem:[#allocation2 + $0x88] sm:$0xff]  ;;  %v751_v43 = vld [vmem:[#allocation2 + $0xf8] sm:$0xff] }
  0x16   :  { %v736_v42 = vld [vmem:[#allocation2 + $0x80] sm:$0xff]  ;;  %423 = vmatpush.bf16.msrb.mxu0 %v751_v43  ;;  %v750_v44 = vld [vmem:[#allocation2 + $0xf0] sm:$0xff]  ;;  %v749_v45 = vld [vmem:[#allocation2 + $0xe8] sm:$0xff] }
  0x17   :  { %341 = vmatpush.bf16.msra.mxu3 %v742_v28  ;;  %v748_v46 = vld [vmem:[#allocation2 + $0xe0] sm:$0xff]  ;;  %v747_v57 = vld [vmem:[#allocation2 + $0xd8] sm:$0xff]  ;;  %v746_v58 = vld [vmem:[#allocation2 + $0xd0] sm:$0xff] }
  0x18   :  { %257 = vmatpush.bf16.msra.mxu2 %v733_v13  ;;  %v769_v48 = vld [vmem:[%s933_s4 + $0x2] ss:$0 sm:$0xff]  ;;  %v745_v59 = vld [vmem:[#allocation2 + $0xc8] sm:$0xff]  ;;  %v759_v61 = vld [vmem:[#allocation5 + $0x38] sm:$0xff] }
  0x19   :  { %175 = vmatpush.bf16.msra.mxu1 %v724_v6  ;;  %v744_v60 = vld [vmem:[#allocation2 + $0xc0] sm:$0xff]  ;;  %v758_v62 = vld [vmem:[#allocation5 + $0x30] sm:$0xff]  ;;  %v757_v63 = vld [vmem:[#allocation5 + $0x28] sm:$0xff] }
  0x1a   :  { %424 = vmatpush.bf16.msrb.mxu0 %v750_v44  ;;  %v756_v0 = vld [vmem:[#allocation5 + $0x20] sm:$0xff]  ;;  %v753_v11 = vld [vmem:[#allocation5 + $0x8] sm:$0xff] }
  0x1b   :  { %342 = vmatpush.bf16.msra.mxu3 %v741_v29  ;;  %v770_v2 = vld [vmem:[%s933_s4 + $0x3] ss:$0 sm:$0xff] }
  0x1c   :  { %258 = vmatpush.bf16.msra.mxu2 %v732_v14  ;;  %v752_v12 = vld [vmem:[#allocation5] sm:$0xff] }
  0x1d   :  { %176 = vmatpush.bf16.msra.mxu1 %v723_v7  ;;  %v771_v14 = vld [vmem:[%s933_s4 + $0x4] ss:$0 sm:$0xff]  ;;  %s530_s4 = sshll.u32 %s935_s6, 4  ;;  %s531_s4 = int_to_ptr.hbm [resolvable:$true] %s530_s4 }
  0x1e   :  { %425 = vmatpush.bf16.msrb.mxu0 %v749_v45 }
  0x1f   :  { %343 = vmatpush.bf16.msra.mxu3 %v740_v30 }
  0x20   :  { %259 = vmatpush.bf16.msra.mxu2 %v731_v23 }
  0x21   :  { %177 = vmatpush.bf16.msra.mxu1 %v722_v8 }
  0x22   :  { %426 = vmatpush.bf16.msrb.mxu0 %v748_v46 }
  0x23   :  { %344 = vmatpush.bf16.msra.mxu3 %v739_v39 }
  0x24   :  { %260 = vmatpush.bf16.msra.mxu2 %v730_v24 }
  0x25   :  { %178 = vmatpush.bf16.msra.mxu1 %v721_v9  ;;  %v755_v9 = vld [vmem:[#allocation5 + $0x18] sm:$0xff] }
  0x26   :  { %427 = vmatpush.bf16.msrb.mxu0 %v747_v57 }
  0x27   :  { %345 = vmatpush.bf16.msra.mxu3 %v738_v40 }
  0x28   :  { %261 = vmatpush.bf16.msra.mxu2 %v729_v25 }
  0x29   :  { %179 = vmatpush.bf16.msra.mxu1 %v720_v10  ;;  %v754_v10 = vld [vmem:[#allocation5 + $0x10] sm:$0xff] }
  0x2a   :  { %428 = vmatpush.bf16.msrb.mxu0 %v746_v58 }
  0x2b   :  { %346 = vmatpush.bf16.msra.mxu3 %v737_v41 }
  0x2c   :  { %262 = vmatpush.bf16.msra.mxu2 %v728_v26 }
  0x2d   :  { %508 = vmatpush.bf16.msrb.mxu1 %v759_v61 }
  0x2e   :  { %429 = vmatpush.bf16.msrb.mxu0 %v745_v59 }
  0x2f   :  { %347 = vmatpush.bf16.msra.mxu3 %v736_v42 }
  0x31   :  { %509 = vmatpush.bf16.msrb.mxu1 %v758_v62 }
  0x32   :  { %430 = vmatpush.bf16.msrb.mxu0 %v744_v60 }
  0x35   :  { %510 = vmatpush.bf16.msrb.mxu1 %v757_v63 }
  0x39   :  { %511 = vmatpush.bf16.msrb.mxu1 %v756_v0 }
  0x3d   :  { %512 = vmatpush.bf16.msrb.mxu1 %v755_v9 }
  0x41   :  { %513 = vmatpush.bf16.msrb.mxu1 %v754_v10 }
  0x45   :  { %514 = vmatpush.bf16.msrb.mxu1 %v753_v11 }
  0x49   :  { %515 = vmatpush.bf16.msrb.mxu1 %v752_v12 }
  0x91   :  { %v99_v15 = vpop.f32.mrf.mxu0 }
  0x92   :  { %v100_v17 = vadd.f32 %v767_v16, %v99_v15 }
  0x94   :  { %v104_v20 = vmax.f32 %v100_v17, 0.0 }
  0x99   :  { %v101_v18 = vpop.f32.mrf.mxu0 }
  0x9a   :  { %v102_v19 = vadd.f32 %v767_v16, %v101_v18 }
  0x9c   :  { %v105_v21 = vmax.f32 %v102_v19, 0.0 }
  0x9e   :  { %v106_v22 = vpack.c.bf16 %v105_v21, %v104_v20  ;;  %v772_v21 = vld [vmem:[%s934_s5] ss:$0 sm:$0xff] }
  0xa0   :  { %180 = vmatmul.bf16.vlgmr.msra.gmra.mxu1 %v106_v22 }
 0x11d   :  { %v181_v31 = vpop.f32.mrf.mxu1 }
 0x11e   :  { %v182_v33 = vadd.f32 %v768_v32, %v181_v31 }
 0x120   :  { %v186_v36 = vmax.f32 %v182_v33, 0.0 }
 0x125   :  { %v183_v34 = vpop.f32.mrf.mxu1 }
 0x126   :  { %v184_v35 = vadd.f32 %v768_v32, %v183_v34 }
 0x128   :  { %v187_v37 = vmax.f32 %v184_v35, 0.0 }
 0x12a   :  { %v188_v38 = vpack.c.bf16 %v187_v37, %v186_v36 }
 0x12c   :  { %263 = vmatmul.bf16.vlgmr.msra.gmra.mxu2 %v188_v38 }
 0x1af   :  { %v264_v47 = vpop.f32.mrf.mxu2 }
 0x1b0   :  { %v265_v49 = vadd.f32 %v769_v48, %v264_v47 }
 0x1b2   :  { %v269_v51 = vadd.f32 %v265_v49, %v100_v17 }
 0x1b4   :  { %v271_v54 = vmax.f32 %v269_v51, 0.0 }
 0x1b7   :  { %v266_v50 = vpop.f32.mrf.mxu2 }
 0x1b8   :  { %v267_v52 = vadd.f32 %v769_v48, %v266_v50 }
 0x1ba   :  { %v270_v53 = vadd.f32 %v267_v52, %v102_v19 }
 0x1bc   :  { %v272_v55 = vmax.f32 %v270_v53, 0.0 }
 0x1be   :  { %v273_v56 = vpack.c.bf16 %v272_v55, %v271_v54 }
 0x1c0   :  { %348 = vmatmul.bf16.vlgmr.msra.gmra.mxu3 %v273_v56 }
 0x243   :  { %v349_v1 = vpop.f32.mrf.mxu3 }
 0x244   :  { %v350_v3 = vadd.f32 %v770_v2, %v349_v1 }
 0x246   :  { %v354_v6 = vmax.f32 %v350_v3, 0.0 }
 0x24b   :  { %v351_v4 = vpop.f32.mrf.mxu3 }
 0x24c   :  { %v352_v5 = vadd.f32 %v770_v2, %v351_v4 }
 0x24e   :  { %v355_v7 = vmax.f32 %v352_v5, 0.0 }
 0x250   :  { %v356_v8 = vpack.c.bf16 %v355_v7, %v354_v6 }
 0x252   :  { %431 = vmatmul.bf16.vlgmr.msrb.gmra.mxu0 %v356_v8 }
 0x2cf   :  { %v432_v13 = vpop.f32.mrf.mxu0 }
 0x2d0   :  { %v433_v15 = vadd.f32 %v771_v14, %v432_v13 }
 0x2d2   :  { %v437_v18 = vadd.f32 %v433_v15, %v269_v51 }
 0x2d7   :  { %v434_v16 = vpop.f32.mrf.mxu0 }
 0x2d8   :  { %v435_v17 = vadd.f32 %v771_v14, %v434_v16 }
 0x2da   :  { %v438_v19 = vadd.f32 %v435_v17, %v270_v53 }
 0x2dc   :  { %v439_v20 = vpack.c.bf16 %v438_v19, %v437_v18 }
 0x2de   :  { %516 = vmatmul.bf16.vlgmr.msrb.gmra.mxu1 %v439_v20 }
 0x35b   :  { %v517_v22 = vpop.f32.mrf.mxu1 }
 0x35c   :  { %v518_v23 = vadd.f32 %v772_v21, %v517_v22 }
 0x35e   :  { %522 = vst [vmem:[#allocation7] sm:$0xff] %v518_v23 }
 0x363   :  { %v519_v24 = vpop.f32.mrf.mxu1 }
 0x364   :  { %v520_v25 = vadd.f32 %v772_v21, %v519_v24 }
 0x366   :  { %523 = vst [vmem:[#allocation7 + $0x8] sm:$0xff] %v520_v25 }
 0x367   :  { %536 = dma.vmem_to_hbm [thread:$0]  %s529_s24, 256, %s531_s4, [#allocation4], %s856_s27, %s856_s27, %s857_s28  }
 0x368   :  { %849 = dma.done.wait [#allocation4], 256  }
 0x369   :  { %850 = vsyncadd [#allocation4], 4294967040 }
 0x36a   :  { %541 = vsyncpa [#allocation3], 1 }
 0x36b   :  { %542 = vsyncpa [#allocation6], 1 }
 0x36c   :  { %543 = vsyncpa [#allocation4], 1 }

</bundles_post_ra>
